<compile_context>
chip_gen: v7x
topology: tpu7x:2x2x1
jax: 0.10.0
libtpu: 0.0.40
codegen_flags: <defaults>
</compile_context>

<pallas_src>
import numpy as np
import jax
import jax.numpy as jnp
from jax.experimental import pallas as pl
from jax.experimental.pallas import tpu as pltpu

_LANES = 128


def _make_kernel(B):
    # static row offsets inside the packed [nrows, 128] slab
    X0, Y0, Z0 = 0 * B, 1 * B, 2 * B
    U0, V0 = 3 * B, 4 * B
    C0, W0 = 5 * B, 6 * B        # joints_conf, joint_weights
    P0 = 7 * B                   # priors (pe | betas | lhand | rhand | expr | jaw)
    A0 = 8 * B                   # sign-applied bending-prior pose columns
    CW = 9 * B                   # per-lane squared prior weights
    BW = 9 * B + 1               # bending weight row (bend_w on lanes 0..3)

    def kernel(s_ref, slab_ref, out_ref):
        rho = s_ref[0]
        dw = s_ref[1]
        rho2 = rho * rho
        d = slab_ref

        # ---- confidence-weighted GMoF 2D data term, per batch (scalar camera)
        data_lane = None
        for b in range(B):
            x = d[pl.ds(X0 + b, 1), :]
            y = d[pl.ds(Y0 + b, 1), :]
            z = d[pl.ds(Z0 + b, 1), :]
            gu = d[pl.ds(U0 + b, 1), :]
            gv = d[pl.ds(V0 + b, 1), :]
            w = d[pl.ds(C0 + b, 1), :] * d[pl.ds(W0 + b, 1), :]   # conf * joint_weights

            def c(k, _b=b):
                return s_ref[2 + 16 * _b + k]

            # perspective camera: p = R x + t ; img = f * p_xy / p_z + c
            px = c(0) * x + c(1) * y + c(2) * z + c(9)
            py = c(3) * x + c(4) * y + c(5) * z + c(10)
            pz = c(6) * x + c(7) * y + c(8) * z + c(11)
            # TODO(synk): no clamp on pz (same exposure as the PyTorch reference);
            # inputs are assumed in front of the camera.
            inv = pl.reciprocal(pz, approx=True)
            inv = inv * (2.0 - pz * inv)          # one Newton step -> ~exact 1/pz
            ix = c(12) * px * inv + c(14)
            iy = c(13) * py * inv + c(15)

            # GMoF robustifier (approx reciprocal OK: result bounded by rho^2)
            dx = gu - ix
            dy = gv - iy
            sqx = dx * dx
            sqy = dy * dy
            gx = rho2 * sqx * pl.reciprocal(sqx + rho2, approx=True)
            gy = rho2 * sqy * pl.reciprocal(sqy + rho2, approx=True)
            t = (w * w) * (gx + gy)               # [1, 128]
            data_lane = t if data_lane is None else data_lane + t
        data_lane = data_lane * (dw * dw)

        # ---- all priors: one elementwise pass over [B, 128] + fused reduction
        pv = d[pl.ds(P0, B), :]                   # prior values      [B, 128]
        av = d[pl.ds(A0, B), :]                   # bending columns   [B, 128]
        colw = d[pl.ds(CW, 1), :]                 # squared weights   [1, 128]
        bw = d[pl.ds(BW, 1), :]                   # bend_w on 4 lanes [1, 128]
        e = jnp.exp(av)                           # exp(0)=1 on pad lanes, bw=0 there
        pri_lane = jnp.sum(pv * pv * colw + e * e * bw, axis=0, keepdims=True)

        # TODO(synk): interpenetration term (BVH search_tree / pen_distance /
        # tri_filtering_module) has no Pallas equivalent; coll_loss_weight
        # defaults to 0 so pen_loss == 0 in this forward.

        out_ref[...] = jnp.sum(data_lane + pri_lane, axis=1, keepdims=True)

    return kernel


def smplify_loss_forward(joints3d, gt_joints, joints_conf, joint_weights,
                         rotation, translation, focal, center,
                         pose_embedding, betas, body_pose,
                         left_hand_pose, right_hand_pose, expression, jaw_pose,
                         *, rho, data_weight, body_pose_weight, shape_weight,
                         bending_prior_weight, hand_prior_weight,
                         expr_prior_weight, jaw_prior_weight):
    f32 = jnp.float32
    B, J, _ = joints3d.shape
    assert J <= _LANES and B <= 8, "single-call packing assumes J<=128, B<=8"

    # ---- joint-shaped channels: [7, B, J] -> rows c*B + b, lane-padded to 128
    jdata = jnp.stack([joints3d[..., 0], joints3d[..., 1], joints3d[..., 2],
                       gt_joints[..., 0], gt_joints[..., 1],
                       joints_conf, joint_weights], axis=0).astype(f32)
    jdata = jnp.pad(jdata.reshape(7 * B, J), ((0, 0), (0, _LANES - J)))

    # ---- priors (lane-dense, per-batch row) + bending-prior columns
    # bending prior: body_pose[:, [52, 55, 9, 12]] with signs [+, -, -, -]
    bend = jnp.stack([body_pose[:, 52], -body_pose[:, 55],
                      -body_pose[:, 9], -body_pose[:, 12]], axis=1).astype(f32)
    pri = jnp.concatenate([pose_embedding, betas, left_hand_pose,
                           right_hand_pose, expression, jaw_pose],
                          axis=1).astype(f32)                       # [B, n_pri]
    n_pri = pri.shape[1]
    pri = jnp.pad(pri, ((0, 0), (0, _LANES - n_pri)))
    bend = jnp.pad(bend, ((0, 0), (0, _LANES - 4)))

    # ---- per-lane prior weights (precomputed; fuses into the XLA packing)
    d_pe, d_bt = pose_embedding.shape[1], betas.shape[1]
    d_lh, d_rh = left_hand_pose.shape[1], right_hand_pose.shape[1]
    d_ex, d_jw = expression.shape[1], jaw_pose.shape[1]
    colw = jnp.concatenate([
        jnp.full((1, d_pe), body_pose_weight ** 2, f32),
        jnp.full((1, d_bt), shape_weight ** 2, f32),
        jnp.full((1, d_lh + d_rh), hand_prior_weight ** 2, f32),
        jnp.full((1, d_ex), expr_prior_weight ** 2, f32),
        jnp.full((1, d_jw), jaw_prior_weight ** 2, f32),
        jnp.zeros((1, _LANES - n_pri), f32)], axis=1)
    bendw = jnp.concatenate([
        jnp.full((1, 4), bending_prior_weight, f32),
        jnp.zeros((1, _LANES - 4), f32)], axis=1)

    # ---- one VMEM slab [9B+2 -> pad8, 128]
    nrows = 9 * B + 2
    nrows_pad = -(-nrows // 8) * 8
    slab = jnp.concatenate([jdata, pri, bend, colw, bendw], axis=0)
    slab = jnp.pad(slab, ((0, nrows_pad - nrows), (0, 0)))

    # ---- SMEM scalars: [rho, data_weight] + per-batch camera constants
    cam = jnp.concatenate([rotation.reshape(B, 9), translation, focal, center],
                          axis=1).astype(f32)                       # [B, 16]
    scalars = jnp.concatenate([jnp.array([rho, data_weight], f32),
                               cam.reshape(-1)])                    # [2 + 16B]

    smem = pl.BlockSpec(memory_space=pltpu.MemorySpace.SMEM)
    vmem = pl.BlockSpec(memory_space=pltpu.MemorySpace.VMEM)

    out = pl.pallas_call(
        _make_kernel(B),
        out_shape=jax.ShapeDtypeStruct((1, 1), f32),
        in_specs=[smem, vmem],
        out_specs=vmem,
    )(scalars, slab)
    return out[0, 0]


def smplify_loss_ref(joints3d, gt_joints, joints_conf, joint_weights,
                     rotation, translation, focal, center,
                     pose_embedding, betas, body_pose,
                     left_hand_pose, right_hand_pose, expression, jaw_pose,
                     *, rho, data_weight, body_pose_weight, shape_weight,
                     bending_prior_weight, hand_prior_weight,
                     expr_prior_weight, jaw_prior_weight):
    # Pure-JAX mirror of the PyTorch SMPLifyLoss.forward (use_vposer=True,
    # L2 shape/hand/expression/jaw priors, interpenetration disabled).
    proj = jnp.einsum('bki,bji->bjk', rotation, joints3d) + translation[:, None, :]
    img = proj[..., :2] / proj[..., 2:3]
    img = img * focal[:, None, :] + center[:, None, :]
    residual = gt_joints - img
    sq = residual ** 2
    joint_diff = rho ** 2 * sq / (sq + rho ** 2)                # GMoF
    w = (joint_weights * joints_conf)[..., None]
    joint_loss = jnp.sum(w ** 2 * joint_diff) * data_weight ** 2
    pprior = jnp.sum(pose_embedding ** 2) * body_pose_weight ** 2
    shape_loss = jnp.sum(betas ** 2) * shape_weight ** 2
    idxs = jnp.array([52, 55, 9, 12])
    signs = jnp.array([1.0, -1.0, -1.0, -1.0], dtype=jnp.float32)
    angle_loss = jnp.sum(jnp.exp(body_pose[:, idxs] * signs) ** 2) * bending_prior_weight
    lh = jnp.sum(left_hand_pose ** 2) * hand_prior_weight ** 2
    rh = jnp.sum(right_hand_pose ** 2) * hand_prior_weight ** 2
    expr = jnp.sum(expression ** 2) * expr_prior_weight ** 2
    jawl = jnp.sum((jaw_pose * jaw_prior_weight) ** 2)
    return joint_loss + pprior + shape_loss + angle_loss + lh + rh + expr + jawl


if __name__ == "__main__":
    B, J = 2, 16
    key = jax.random.PRNGKey(0)
    keys = jax.random.split(key, 16)

    joints3d = jax.random.normal(keys[0], (B, J, 3), dtype=jnp.float32)
    gt_joints = jax.random.uniform(keys[1], (B, J, 2), dtype=jnp.float32) * 256.0
    joints_conf = jax.random.uniform(keys[2], (B, J), dtype=jnp.float32)
    joint_weights = jax.random.uniform(keys[3], (B, J), dtype=jnp.float32)

    # Near-identity rotation, translation with z offset so p_z stays > 0.
    rotation = (jnp.eye(3, dtype=jnp.float32)[None]
                + 0.05 * jax.random.normal(keys[4], (B, 3, 3), dtype=jnp.float32))
    translation = (jnp.array([0.1, -0.2, 10.0], dtype=jnp.float32)[None]
                   + 0.1 * jax.random.normal(keys[5], (B, 3), dtype=jnp.float32))
    focal = jnp.full((B, 2), 500.0, dtype=jnp.float32)
    center = jnp.full((B, 2), 128.0, dtype=jnp.float32)

    pose_embedding = 0.5 * jax.random.normal(keys[6], (B, 32), dtype=jnp.float32)
    betas = 0.5 * jax.random.normal(keys[7], (B, 10), dtype=jnp.float32)
    full_pose = 0.3 * jax.random.normal(keys[8], (B, 165), dtype=jnp.float32)
    body_pose = full_pose[:, 3:66]                              # [B, 63]
    left_hand_pose = 0.3 * jax.random.normal(keys[9], (B, 12), dtype=jnp.float32)
    right_hand_pose = 0.3 * jax.random.normal(keys[10], (B, 12), dtype=jnp.float32)
    expression = 0.3 * jax.random.normal(keys[11], (B, 10), dtype=jnp.float32)
    jaw_pose = 0.2 * jax.random.normal(keys[12], (B, 3), dtype=jnp.float32)

    weights = dict(rho=100.0, data_weight=1.0, body_pose_weight=0.5,
                   shape_weight=0.3, bending_prior_weight=0.2,
                   hand_prior_weight=0.4, expr_prior_weight=0.6,
                   jaw_prior_weight=0.7)

    loss = smplify_loss_forward(
        joints3d, gt_joints, joints_conf, joint_weights,
        rotation, translation, focal, center,
        pose_embedding, betas, body_pose,
        left_hand_pose, right_hand_pose, expression, jaw_pose, **weights)
    loss = jax.block_until_ready(loss)

    ref = smplify_loss_ref(
        joints3d, gt_joints, joints_conf, joint_weights,
        rotation, translation, focal, center,
        pose_embedding, betas, body_pose,
        left_hand_pose, right_hand_pose, expression, jaw_pose, **weights)
    # inv_z is Newton-refined (projection path ~exact); residual slack covers
    # only the EUP approx reciprocals in the GMoF denominators.
    np.testing.assert_allclose(np.asarray(loss), np.asarray(ref),
                               rtol=3e-3, atol=1e-2)
    print("KERNEL_OK")
</pallas_src>

<mosaic_0001>
module attributes {stable_mosaic.version = 11 : i64} {
  func.func @kernel(%arg0: memref<34xf32, #tpu.memory_space<smem>>, %arg1: memref<24x128xf32, #tpu.memory_space<vmem>>, %arg2: memref<1x1xf32, #tpu.memory_space<vmem>>) attributes {dimension_semantics = [], scalar_prefetch = 0 : i64, scratch_operands = 0 : i64, tpu.core_type = #tpu.core_type<tc>} {
    %c0 = arith.constant 0 : index
    %0 = memref.load %arg0[%c0] : memref<34xf32, #tpu.memory_space<smem>>
    %c1 = arith.constant 1 : index
    %1 = memref.load %arg0[%c1] : memref<34xf32, #tpu.memory_space<smem>>
    %2 = arith.mulf %0, %0 : f32
    %c0_0 = arith.constant 0 : index
    %c0_1 = arith.constant 0 : index
    %3 = vector.load %arg1[%c0_0, %c0_1] : memref<24x128xf32, #tpu.memory_space<vmem>>, vector<1x128xf32>
    %c2 = arith.constant 2 : index
    %c0_2 = arith.constant 0 : index
    %4 = vector.load %arg1[%c2, %c0_2] : memref<24x128xf32, #tpu.memory_space<vmem>>, vector<1x128xf32>
    %c4 = arith.constant 4 : index
    %c0_3 = arith.constant 0 : index
    %5 = vector.load %arg1[%c4, %c0_3] : memref<24x128xf32, #tpu.memory_space<vmem>>, vector<1x128xf32>
    %c6 = arith.constant 6 : index
    %c0_4 = arith.constant 0 : index
    %6 = vector.load %arg1[%c6, %c0_4] : memref<24x128xf32, #tpu.memory_space<vmem>>, vector<1x128xf32>
    %c8 = arith.constant 8 : index
    %c0_5 = arith.constant 0 : index
    %7 = vector.load %arg1[%c8, %c0_5] : memref<24x128xf32, #tpu.memory_space<vmem>>, vector<1x128xf32>
    %c10 = arith.constant 10 : index
    %c0_6 = arith.constant 0 : index
    %8 = vector.load %arg1[%c10, %c0_6] : memref<24x128xf32, #tpu.memory_space<vmem>>, vector<1x128xf32>
    %c12 = arith.constant 12 : index
    %c0_7 = arith.constant 0 : index
    %9 = vector.load %arg1[%c12, %c0_7] : memref<24x128xf32, #tpu.memory_space<vmem>>, vector<1x128xf32>
    %10 = arith.mulf %8, %9 : vector<1x128xf32>
    %c2_8 = arith.constant 2 : index
    %11 = memref.load %arg0[%c2_8] : memref<34xf32, #tpu.memory_space<smem>>
    %12 = vector.broadcast %11 : f32 to vector<1x128xf32>
    %13 = arith.mulf %12, %3 : vector<1x128xf32>
    %c3 = arith.constant 3 : index
    %14 = memref.load %arg0[%c3] : memref<34xf32, #tpu.memory_space<smem>>
    %15 = vector.broadcast %14 : f32 to vector<1x128xf32>
    %16 = arith.mulf %15, %4 : vector<1x128xf32>
    %17 = arith.addf %13, %16 : vector<1x128xf32>
    %c4_9 = arith.constant 4 : index
    %18 = memref.load %arg0[%c4_9] : memref<34xf32, #tpu.memory_space<smem>>
    %19 = vector.broadcast %18 : f32 to vector<1x128xf32>
    %20 = arith.mulf %19, %5 : vector<1x128xf32>
    %21 = arith.addf %17, %20 : vector<1x128xf32>
    %c11 = arith.constant 11 : index
    %22 = memref.load %arg0[%c11] : memref<34xf32, #tpu.memory_space<smem>>
    %23 = vector.broadcast %22 : f32 to vector<1x128xf32>
    %24 = arith.addf %21, %23 : vector<1x128xf32>
    %c5 = arith.constant 5 : index
    %25 = memref.load %arg0[%c5] : memref<34xf32, #tpu.memory_space<smem>>
    %26 = vector.broadcast %25 : f32 to vector<1x128xf32>
    %27 = arith.mulf %26, %3 : vector<1x128xf32>
    %c6_10 = arith.constant 6 : index
    %28 = memref.load %arg0[%c6_10] : memref<34xf32, #tpu.memory_space<smem>>
    %29 = vector.broadcast %28 : f32 to vector<1x128xf32>
    %30 = arith.mulf %29, %4 : vector<1x128xf32>
    %31 = arith.addf %27, %30 : vector<1x128xf32>
    %c7 = arith.constant 7 : index
    %32 = memref.load %arg0[%c7] : memref<34xf32, #tpu.memory_space<smem>>
    %33 = vector.broadcast %32 : f32 to vector<1x128xf32>
    %34 = arith.mulf %33, %5 : vector<1x128xf32>
    %35 = arith.addf %31, %34 : vector<1x128xf32>
    %c12_11 = arith.constant 12 : index
    %36 = memref.load %arg0[%c12_11] : memref<34xf32, #tpu.memory_space<smem>>
    %37 = vector.broadcast %36 : f32 to vector<1x128xf32>
    %38 = arith.addf %35, %37 : vector<1x128xf32>
    %c8_12 = arith.constant 8 : index
    %39 = memref.load %arg0[%c8_12] : memref<34xf32, #tpu.memory_space<smem>>
    %40 = vector.broadcast %39 : f32 to vector<1x128xf32>
    %41 = arith.mulf %40, %3 : vector<1x128xf32>
    %c9 = arith.constant 9 : index
    %42 = memref.load %arg0[%c9] : memref<34xf32, #tpu.memory_space<smem>>
    %43 = vector.broadcast %42 : f32 to vector<1x128xf32>
    %44 = arith.mulf %43, %4 : vector<1x128xf32>
    %45 = arith.addf %41, %44 : vector<1x128xf32>
    %c10_13 = arith.constant 10 : index
    %46 = memref.load %arg0[%c10_13] : memref<34xf32, #tpu.memory_space<smem>>
    %47 = vector.broadcast %46 : f32 to vector<1x128xf32>
    %48 = arith.mulf %47, %5 : vector<1x128xf32>
    %49 = arith.addf %45, %48 : vector<1x128xf32>
    %c13 = arith.constant 13 : index
    %50 = memref.load %arg0[%c13] : memref<34xf32, #tpu.memory_space<smem>>
    %51 = vector.broadcast %50 : f32 to vector<1x128xf32>
    %52 = arith.addf %49, %51 : vector<1x128xf32>
    %53 = tpu.reciprocal %52 {approx = true} : vector<1x128xf32> -> vector<1x128xf32>
    %54 = arith.mulf %52, %53 : vector<1x128xf32>
    %cst = arith.constant 2.000000e+00 : f32
    %55 = vector.broadcast %cst : f32 to vector<1x128xf32>
    %56 = arith.subf %55, %54 : vector<1x128xf32>
    %57 = arith.mulf %53, %56 : vector<1x128xf32>
    %c14 = arith.constant 14 : index
    %58 = memref.load %arg0[%c14] : memref<34xf32, #tpu.memory_space<smem>>
    %59 = vector.broadcast %58 : f32 to vector<1x128xf32>
    %60 = arith.mulf %59, %24 : vector<1x128xf32>
    %61 = arith.mulf %60, %57 : vector<1x128xf32>
    %c16 = arith.constant 16 : index
    %62 = memref.load %arg0[%c16] : memref<34xf32, #tpu.memory_space<smem>>
    %63 = vector.broadcast %62 : f32 to vector<1x128xf32>
    %64 = arith.addf %61, %63 : vector<1x128xf32>
    %c15 = arith.constant 15 : index
    %65 = memref.load %arg0[%c15] : memref<34xf32, #tpu.memory_space<smem>>
    %66 = vector.broadcast %65 : f32 to vector<1x128xf32>
    %67 = arith.mulf %66, %38 : vector<1x128xf32>
    %68 = arith.mulf %67, %57 : vector<1x128xf32>
    %c17 = arith.constant 17 : index
    %69 = memref.load %arg0[%c17] : memref<34xf32, #tpu.memory_space<smem>>
    %70 = vector.broadcast %69 : f32 to vector<1x128xf32>
    %71 = arith.addf %68, %70 : vector<1x128xf32>
    %72 = arith.subf %6, %64 : vector<1x128xf32>
    %73 = arith.subf %7, %71 : vector<1x128xf32>
    %74 = arith.mulf %72, %72 : vector<1x128xf32>
    %75 = arith.mulf %73, %73 : vector<1x128xf32>
    %76 = vector.broadcast %2 : f32 to vector<1x128xf32>
    %77 = arith.mulf %76, %74 : vector<1x128xf32>
    %78 = vector.broadcast %2 : f32 to vector<1x128xf32>
    %79 = arith.addf %74, %78 : vector<1x128xf32>
    %80 = tpu.reciprocal %79 {approx = true} : vector<1x128xf32> -> vector<1x128xf32>
    %81 = arith.mulf %77, %80 : vector<1x128xf32>
    %82 = vector.broadcast %2 : f32 to vector<1x128xf32>
    %83 = arith.mulf %82, %75 : vector<1x128xf32>
    %84 = vector.broadcast %2 : f32 to vector<1x128xf32>
    %85 = arith.addf %75, %84 : vector<1x128xf32>
    %86 = tpu.reciprocal %85 {approx = true} : vector<1x128xf32> -> vector<1x128xf32>
    %87 = arith.mulf %83, %86 : vector<1x128xf32>
    %88 = arith.mulf %10, %10 : vector<1x128xf32>
    %89 = arith.addf %81, %87 : vector<1x128xf32>
    %90 = arith.mulf %88, %89 : vector<1x128xf32>
    %c1_14 = arith.constant 1 : index
    %c0_15 = arith.constant 0 : index
    %91 = vector.load %arg1[%c1_14, %c0_15] : memref<24x128xf32, #tpu.memory_space<vmem>>, vector<1x128xf32>
    %c3_16 = arith.constant 3 : index
    %c0_17 = arith.constant 0 : index
    %92 = vector.load %arg1[%c3_16, %c0_17] : memref<24x128xf32, #tpu.memory_space<vmem>>, vector<1x128xf32>
    %c5_18 = arith.constant 5 : index
    %c0_19 = arith.constant 0 : index
    %93 = vector.load %arg1[%c5_18, %c0_19] : memref<24x128xf32, #tpu.memory_space<vmem>>, vector<1x128xf32>
    %c7_20 = arith.constant 7 : index
    %c0_21 = arith.constant 0 : index
    %94 = vector.load %arg1[%c7_20, %c0_21] : memref<24x128xf32, #tpu.memory_space<vmem>>, vector<1x128xf32>
    %c9_22 = arith.constant 9 : index
    %c0_23 = arith.constant 0 : index
    %95 = vector.load %arg1[%c9_22, %c0_23] : memref<24x128xf32, #tpu.memory_space<vmem>>, vector<1x128xf32>
    %c11_24 = arith.constant 11 : index
    %c0_25 = arith.constant 0 : index
    %96 = vector.load %arg1[%c11_24, %c0_25] : memref<24x128xf32, #tpu.memory_space<vmem>>, vector<1x128xf32>
    %c13_26 = arith.constant 13 : index
    %c0_27 = arith.constant 0 : index
    %97 = vector.load %arg1[%c13_26, %c0_27] : memref<24x128xf32, #tpu.memory_space<vmem>>, vector<1x128xf32>
    %98 = arith.mulf %96, %97 : vector<1x128xf32>
    %c18 = arith.constant 18 : index
    %99 = memref.load %arg0[%c18] : memref<34xf32, #tpu.memory_space<smem>>
    %100 = vector.broadcast %99 : f32 to vector<1x128xf32>
    %101 = arith.mulf %100, %91 : vector<1x128xf32>
    %c19 = arith.constant 19 : index
    %102 = memref.load %arg0[%c19] : memref<34xf32, #tpu.memory_space<smem>>
    %103 = vector.broadcast %102 : f32 to vector<1x128xf32>
    %104 = arith.mulf %103, %92 : vector<1x128xf32>
    %105 = arith.addf %101, %104 : vector<1x128xf32>
    %c20 = arith.constant 20 : index
    %106 = memref.load %arg0[%c20] : memref<34xf32, #tpu.memory_space<smem>>
    %107 = vector.broadcast %106 : f32 to vector<1x128xf32>
    %108 = arith.mulf %107, %93 : vector<1x128xf32>
    %109 = arith.addf %105, %108 : vector<1x128xf32>
    %c27 = arith.constant 27 : index
    %110 = memref.load %arg0[%c27] : memref<34xf32, #tpu.memory_space<smem>>
    %111 = vector.broadcast %110 : f32 to vector<1x128xf32>
    %112 = arith.addf %109, %111 : vector<1x128xf32>
    %c21 = arith.constant 21 : index
    %113 = memref.load %arg0[%c21] : memref<34xf32, #tpu.memory_space<smem>>
    %114 = vector.broadcast %113 : f32 to vector<1x128xf32>
    %115 = arith.mulf %114, %91 : vector<1x128xf32>
    %c22 = arith.constant 22 : index
    %116 = memref.load %arg0[%c22] : memref<34xf32, #tpu.memory_space<smem>>
    %117 = vector.broadcast %116 : f32 to vector<1x128xf32>
    %118 = arith.mulf %117, %92 : vector<1x128xf32>
    %119 = arith.addf %115, %118 : vector<1x128xf32>
    %c23 = arith.constant 23 : index
    %120 = memref.load %arg0[%c23] : memref<34xf32, #tpu.memory_space<smem>>
    %121 = vector.broadcast %120 : f32 to vector<1x128xf32>
    %122 = arith.mulf %121, %93 : vector<1x128xf32>
    %123 = arith.addf %119, %122 : vector<1x128xf32>
    %c28 = arith.constant 28 : index
    %124 = memref.load %arg0[%c28] : memref<34xf32, #tpu.memory_space<smem>>
    %125 = vector.broadcast %124 : f32 to vector<1x128xf32>
    %126 = arith.addf %123, %125 : vector<1x128xf32>
    %c24 = arith.constant 24 : index
    %127 = memref.load %arg0[%c24] : memref<34xf32, #tpu.memory_space<smem>>
    %128 = vector.broadcast %127 : f32 to vector<1x128xf32>
    %129 = arith.mulf %128, %91 : vector<1x128xf32>
    %c25 = arith.constant 25 : index
    %130 = memref.load %arg0[%c25] : memref<34xf32, #tpu.memory_space<smem>>
    %131 = vector.broadcast %130 : f32 to vector<1x128xf32>
    %132 = arith.mulf %131, %92 : vector<1x128xf32>
    %133 = arith.addf %129, %132 : vector<1x128xf32>
    %c26 = arith.constant 26 : index
    %134 = memref.load %arg0[%c26] : memref<34xf32, #tpu.memory_space<smem>>
    %135 = vector.broadcast %134 : f32 to vector<1x128xf32>
    %136 = arith.mulf %135, %93 : vector<1x128xf32>
    %137 = arith.addf %133, %136 : vector<1x128xf32>
    %c29 = arith.constant 29 : index
    %138 = memref.load %arg0[%c29] : memref<34xf32, #tpu.memory_space<smem>>
    %139 = vector.broadcast %138 : f32 to vector<1x128xf32>
    %140 = arith.addf %137, %139 : vector<1x128xf32>
    %141 = tpu.reciprocal %140 {approx = true} : vector<1x128xf32> -> vector<1x128xf32>
    %142 = arith.mulf %140, %141 : vector<1x128xf32>
    %cst_28 = arith.constant 2.000000e+00 : f32
    %143 = vector.broadcast %cst_28 : f32 to vector<1x128xf32>
    %144 = arith.subf %143, %142 : vector<1x128xf32>
    %145 = arith.mulf %141, %144 : vector<1x128xf32>
    %c30 = arith.constant 30 : index
    %146 = memref.load %arg0[%c30] : memref<34xf32, #tpu.memory_space<smem>>
    %147 = vector.broadcast %146 : f32 to vector<1x128xf32>
    %148 = arith.mulf %147, %112 : vector<1x128xf32>
    %149 = arith.mulf %148, %145 : vector<1x128xf32>
    %c32 = arith.constant 32 : index
    %150 = memref.load %arg0[%c32] : memref<34xf32, #tpu.memory_space<smem>>
    %151 = vector.broadcast %150 : f32 to vector<1x128xf32>
    %152 = arith.addf %149, %151 : vector<1x128xf32>
    %c31 = arith.constant 31 : index
    %153 = memref.load %arg0[%c31] : memref<34xf32, #tpu.memory_space<smem>>
    %154 = vector.broadcast %153 : f32 to vector<1x128xf32>
    %155 = arith.mulf %154, %126 : vector<1x128xf32>
    %156 = arith.mulf %155, %145 : vector<1x128xf32>
    %c33 = arith.constant 33 : index
    %157 = memref.load %arg0[%c33] : memref<34xf32, #tpu.memory_space<smem>>
    %158 = vector.broadcast %157 : f32 to vector<1x128xf32>
    %159 = arith.addf %156, %158 : vector<1x128xf32>
    %160 = arith.subf %94, %152 : vector<1x128xf32>
    %161 = arith.subf %95, %159 : vector<1x128xf32>
    %162 = arith.mulf %160, %160 : vector<1x128xf32>
    %163 = arith.mulf %161, %161 : vector<1x128xf32>
    %164 = vector.broadcast %2 : f32 to vector<1x128xf32>
    %165 = arith.mulf %164, %162 : vector<1x128xf32>
    %166 = vector.broadcast %2 : f32 to vector<1x128xf32>
    %167 = arith.addf %162, %166 : vector<1x128xf32>
    %168 = tpu.reciprocal %167 {approx = true} : vector<1x128xf32> -> vector<1x128xf32>
    %169 = arith.mulf %165, %168 : vector<1x128xf32>
    %170 = vector.broadcast %2 : f32 to vector<1x128xf32>
    %171 = arith.mulf %170, %163 : vector<1x128xf32>
    %172 = vector.broadcast %2 : f32 to vector<1x128xf32>
    %173 = arith.addf %163, %172 : vector<1x128xf32>
    %174 = tpu.reciprocal %173 {approx = true} : vector<1x128xf32> -> vector<1x128xf32>
    %175 = arith.mulf %171, %174 : vector<1x128xf32>
    %176 = arith.mulf %98, %98 : vector<1x128xf32>
    %177 = arith.addf %169, %175 : vector<1x128xf32>
    %178 = arith.mulf %176, %177 : vector<1x128xf32>
    %179 = arith.addf %90, %178 : vector<1x128xf32>
    %180 = arith.mulf %1, %1 : f32
    %181 = vector.broadcast %180 : f32 to vector<1x128xf32>
    %182 = arith.mulf %179, %181 : vector<1x128xf32>
    %c14_29 = arith.constant 14 : index
    %c0_30 = arith.constant 0 : index
    %183 = vector.load %arg1[%c14_29, %c0_30] : memref<24x128xf32, #tpu.memory_space<vmem>>, vector<2x128xf32>
    %c16_31 = arith.constant 16 : index
    %c0_32 = arith.constant 0 : index
    %184 = vector.load %arg1[%c16_31, %c0_32] : memref<24x128xf32, #tpu.memory_space<vmem>>, vector<2x128xf32>
    %c18_33 = arith.constant 18 : index
    %c0_34 = arith.constant 0 : index
    %185 = vector.load %arg1[%c18_33, %c0_34] : memref<24x128xf32, #tpu.memory_space<vmem>>, vector<1x128xf32>
    %c19_35 = arith.constant 19 : index
    %c0_36 = arith.constant 0 : index
    %186 = vector.load %arg1[%c19_35, %c0_36] : memref<24x128xf32, #tpu.memory_space<vmem>>, vector<1x128xf32>
    %187 = math.exp %184 : vector<2x128xf32>
    %188 = arith.mulf %183, %183 : vector<2x128xf32>
    %189 = vector.broadcast %185 : vector<1x128xf32> to vector<2x128xf32>
    %190 = arith.mulf %188, %189 : vector<2x128xf32>
    %191 = arith.mulf %187, %187 : vector<2x128xf32>
    %192 = vector.broadcast %186 : vector<1x128xf32> to vector<2x128xf32>
    %193 = arith.mulf %191, %192 : vector<2x128xf32>
    %194 = arith.addf %190, %193 : vector<2x128xf32>
    %cst_37 = arith.constant dense<0.000000e+00> : vector<128xf32>
    %195 = vector.multi_reduction <add>, %194, %cst_37 [0] : vector<2x128xf32> to vector<128xf32>
    %196 = vector.shape_cast %195 : vector<128xf32> to vector<1x128xf32>
    %197 = arith.addf %182, %196 : vector<1x128xf32>
    %cst_38 = arith.constant dense<0.000000e+00> : vector<1xf32>
    %198 = vector.multi_reduction <add>, %197, %cst_38 [1] : vector<1x128xf32> to vector<1xf32>
    %199 = vector.shape_cast %198 : vector<1xf32> to vector<1x1xf32>
    %c0_39 = arith.constant 0 : index
    %c0_40 = arith.constant 0 : index
    %200 = vector.load %arg2[%c0_39, %c0_40] : memref<1x1xf32, #tpu.memory_space<vmem>>, vector<1x1xf32>
    tpu.vector_store %arg2[%c0_39, %c0_40], %199 {strides = array<i32>} : memref<1x1xf32, #tpu.memory_space<vmem>>, vector<1x1xf32>,
    return
  }
}

</mosaic_0001>

<bundles_post_ra>
// kernel: tpu_custom_call.1
= control target key start
LH: loop header
LB: loop body
LE: loop exit
PB: predicated region body
PF: predicated region fallthrough
CT: control target
= control target key end

     0   :  { %7 = vsyncpa [#allocation5], 0  ;;  %s522_s0 = inlined_call_operand.hbm [shape: f32[34], index: 0, kind: input, shape index: {}]   ;;  %s523_s1 = inlined_call_operand.hbm [shape: f32[24,128], index: 1, kind: input, shape index: {}]   ;;  %s524_s2 = inlined_call_operand.hbm [shape: f32[1,1], index: 2, kind: output, shape index: {}]  }
   0x1   :  { %8 = vsyncpa [#allocation3], 0 }
   0x2   :  { %9 = vsyncpa [#allocation4], 0  ;;  %s315_s11 = scalar_lea.hbm %s522_s0, 16 }
   0x3   :  { %p316_p0 = scmp.ne.s32.totalorder %s522_s0, %s315_s11  ;;  %p319_p1 = scmp.lt.u32.totalorder %s315_s11, %s522_s0 }
   0x5   :  { %p321_p2 = pnand %p319_p1, %p316_p0 }
   0x7   :  { %324 = shalt.err (!%p321_p2)
}
   0x8   :  { %s375_s16 = smov [#allocation2]   ;;  %s376_s19 = smov [#allocation6]  }
   0x9   :  { %17 = dma.hbm_to_smem %s522_s0, 16, %s375_s16, [#allocation5]  }
   0xa   :  { %s23_s20 = sshll.u32 %s376_s19, 4  ;;  %s325_s23 = scalar_lea.hbm %s523_s1, 384  ;;  %s24_s20 = int_to_ptr.vmem [resolvable:$true] %s23_s20 }
   0xb   :  { %p326_p3 = scmp.ne.s32.totalorder %s523_s1, %s325_s23  ;;  %p329_p4 = scmp.lt.u32.totalorder %s325_s23, %s523_s1 }
   0xd   :  { %p331_p5 = pnand %p329_p4, %p326_p3 }
   0xf   :  { %334 = shalt.err (!%p331_p5)
}
  0x10   :  { %s335_s28 = scalar_lea.vmem %s24_s20, 384  ;;  %p340_p7 = scmp.lt.s32.totalorder %s24_s20, %s24_s20 }
  0x11   :  { %p336_p6 = scmp.ne.s32.totalorder %s24_s20, %s335_s28  ;;  %p341_p8 = scmp.lt.s32.totalorder %s335_s28, %s335_s28 }
  0x13   :  { %p342_p9 = por %p341_p8, %p340_p7 }
  0x15   :  { %p343_p10 = pnand %p342_p9, %p336_p6 }
  0x17   :  { %346 = shalt.err (!%p343_p10)
}
  0x18   :  { %s377_s0 = smov 128   ;;  %s378_s29 = smov 8  }
  0x19   :  { %29 = dma.hbm_to_vmem [thread:$0]  %s523_s1, 384, %s24_s20, [#allocation3], %s377_s0, %s377_s0, %s378_s29  }
  0x1a   :  { %369 = dma.done.wait [#allocation5], 16  }
  0x1b   :  { %370 = vsyncadd [#allocation5], 4294967280 }
  0x1c   :  { %371 = dma.done.wait [#allocation3], 384  }
  0x1d   :  { %372 = vsyncadd [#allocation3], 4294966912 }
  0x1e   :  { %36 = sfence }
  0x1f   :  { %s419_s4 = sld [smem:[#allocation2 + $0x2]]  ;;  %s421_s5 = sld [smem:[#allocation2 + $0x3]]  ;;  %v40_v0 = vld [vmem:[#allocation6] sm:$0x1]  ;;  %v41_v1 = vld [vmem:[#allocation6 + $0x2] sm:$0x1] }
  0x20   :  { %s270_s6 = sld [smem:[#allocation2 + $0x8]]  ;;  %s271_s7 = sld [smem:[#allocation2 + $0x9]]  ;;  %v42_v2 = vld [vmem:[#allocation6 + $0x4] sm:$0x1]  ;;  %v124_v23 = vld [vmem:[#allocation6 + $0x1] sm:$0x1] }
  0x21   :  { %s272_s8 = sld [smem:[#allocation2 + $0xa]]  ;;  %s423_s9 = sld [smem:[#allocation2 + $0x5]]  ;;  %v125_v24 = vld [vmem:[#allocation6 + $0x3] sm:$0x1]  ;;  %v126_v25 = vld [vmem:[#allocation6 + $0x5] sm:$0x1] }
  0x22   :  { %s425_s10 = sld [smem:[#allocation2 + $0x6]]  ;;  %s427_s11 = sld [smem:[#allocation2 + $0xd]]  ;;  %v212_v28 = vld [vmem:[#allocation6 + $0x10] sm:$0x3]  ;;  %vm230_vm0 = vcmask 1041408   ;;  %vm239_vm1 = vcmask 1040384  }
  0x23   :  { %s429_s1 = sld [smem:[#allocation2 + $0x4]]  ;;  %s431_s12 = sld [smem:[#allocation2 + $0x7]]  ;;  %v215_v38 = vmul.f32 1.442695, %v212_v28  ;;  %v294_v28 = vld [vmem:[#allocation6 + $0x12] ss:$0 sm:$0xff] }
  0x24   :  { %s433_s13 = sld [smem:[#allocation2 + $0xb]]  ;;  %s435_s14 = sld [smem:[#allocation2 + $0x18]]  ;;  %vm243_vm2 = vcmask 0  }
  0x25   :  { %v49_v8 = vstv %s419_s4  ;;  %v52_v9 = vstv %s421_s5  ;;  %s439_s15 = sld [smem:[#allocation2 + $0x19]]  ;;  %s441_s16 = sld [smem:[#allocation2 + $0x1a]] }
  0x26   :  { %v77_v3 = vstv %s270_s6  ;;  %v80_v5 = vstv %s271_s7  ;;  %s445_s17 = sld [smem:[#allocation2 + $0x12]]  ;;  %s447_s18 = sld [smem:[#allocation2 + $0x13]]  ;;  %v50_v15 = vmul.f32 %v49_v8, %v40_v0  ;;  %v53_v16 = vmul.f32 %v52_v9, %v41_v1 }
  0x27   :  { %v78_v4 = vmul.f32 %v77_v3, %v40_v0  ;;  %v81_v6 = vmul.f32 %v80_v5, %v41_v1  ;;  %v84_v7 = vstv %s272_s8  ;;  %v63_v11 = vstv %s423_s9  ;;  %s450_s19 = sld [smem:[#allocation2 + $0x15]]  ;;  %s452_s20 = sld [smem:[#allocation2 + $0x16]] }
  0x28   :  { %v85_v10 = vmul.f32 %v84_v7, %v42_v2  ;;  %v66_v12 = vstv %s425_s10  ;;  %v88_v14 = vstv %s427_s11  ;;  %s454_s21 = sld [smem:[#allocation2 + $0xc]]  ;;  %s456_s22 = sld [smem:[#allocation2 + $0x1d]]  ;;  %v64_v19 = vmul.f32 %v63_v11, %v40_v0 }
  0x29   :  { %v82_v13 = vadd.f32 %v81_v6, %v78_v4  ;;  %v56_v18 = vstv %s429_s1  ;;  %v67_v20 = vmul.f32 %v66_v12, %v41_v1  ;;  %v70_v21 = vstv %s431_s12  ;;  %s460_s23 = sld [smem:[#allocation2 + $0x14]]  ;;  %s462_s24 = sld [smem:[#allocation2 + $0x17]] }
  0x2a   :  { %v161_v26 = vstv %s435_s14  ;;  %v54_v29 = vadd.f32 %v53_v16, %v50_v15  ;;  %v57_v30 = vmul.f32 %v56_v18, %v42_v2  ;;  %v71_v31 = vmul.f32 %v70_v21, %v42_v2  ;;  %s466_s25 = sld [smem:[#allocation2 + $0xe]]  ;;  %s468_s26 = sld [smem:[#allocation2 + $0xf]]  ;;  %v43_v16 = vld [vmem:[#allocation6 + $0x6] sm:$0x1] }
  0x2b   :  { %v86_v17 = vadd.f32 %v85_v10, %v82_v13  ;;  %v164_v27 = vstv %s439_s15  ;;  %v68_v32 = vadd.f32 %v67_v20, %v64_v19  ;;  %v162_v33 = vmul.f32 %v161_v26, %v124_v23  ;;  %s479_s27 = sld [smem:[#allocation2 + $0x1b]]  ;;  %s482_s28 = sld [smem:[#allocation2 + $0x1c]]  ;;  %v211_v13 = vld [vmem:[#allocation6 + $0xe] sm:$0x3] }
  0x2c   :  { %v165_v34 = vmul.f32 %v164_v27, %v125_v24  ;;  %v168_v35 = vstv %s441_s16  ;;  %v133_v36 = vstv %s445_s17  ;;  %v136_v39 = vstv %s447_s18  ;;  %s485_s0 = sld [smem:[#allocation2 + $0x10]]  ;;  %s487_s29 = sld [smem:[#allocation2 + $0x11]] }
  0x2d   :  { %v89_v22 = vadd.f32 %v88_v14, %v86_v17  ;;  %v169_v37 = vmul.f32 %v168_v35, %v126_v25  ;;  %v147_v40 = vstv %s450_s19  ;;  %v150_v41 = vstv %s452_s20  ;;  %s489_s30 = sld [smem:[#allocation2]]  ;;  %s492_s3 = sld [smem:[#allocation2 + $0x1e]]  ;;  %v44_v17 = vld [vmem:[#allocation6 + $0x8] sm:$0x1] }
  0x2e   :  { %v166_v42 = vadd.f32 %v165_v34, %v162_v33  ;;  %v60_v43 = vstv %s433_s13  ;;  %v74_v44 = vstv %s454_s21  ;;  %v172_v45 = vstv %s456_s22  ;;  %s494_s4 = sld [smem:[#allocation2 + $0x1f]]  ;;  %s500_s5 = sld [smem:[#allocation2 + $0x20]] }
  0x2f   :  { %301 = vrcp.f32 %v89_v22  ;;  %v58_v46 = vadd.f32 %v57_v30, %v54_v29  ;;  %v72_v47 = vadd.f32 %v71_v31, %v68_v32  ;;  %v134_v48 = vmul.f32 %v133_v36, %v124_v23  ;;  %s502_s6 = sld [smem:[#allocation2 + $0x21]]  ;;  %v295_v29 = vld [vmem:[#allocation6 + $0x13] ss:$0 sm:$0xff]  ;;  %s379_s10 = smov [#allocation7]  }
  0x30   :  { %v170_v49 = vadd.f32 %v169_v37, %v166_v42  ;;  %v137_v50 = vmul.f32 %v136_v39, %v125_v24  ;;  %v148_v51 = vmul.f32 %v147_v40, %v124_v23  ;;  %v151_v52 = vmul.f32 %v150_v41, %v125_v24  ;;  %s261_s8 = sld [smem:[#allocation2 + $0x1]]  ;;  %s251_s11 = sshll.u32 %s379_s10, 4  ;;  %s252_s11 = int_to_ptr.vmem [resolvable:$true] %s251_s11 }
  0x31   :  { %303 = vpow2.f32 %v215_v38  ;;  %v140_v53 = vstv %s460_s23  ;;  %v154_v54 = vstv %s462_s24  ;;  %v95_v56 = vstv %s466_s25  ;;  %s347_s1 = scalar_lea.vmem %s252_s11, 16  ;;  %s351_s12 = scalar_lea.vmem %s252_s11, 32 }
  0x32   :  { %v173_v55 = vadd.f32 %v172_v45, %v170_v49  ;;  %v61_v57 = vadd.f32 %v60_v43, %v58_v46  ;;  %v75_v58 = vadd.f32 %v74_v44, %v72_v47  ;;  %v102_v59 = vstv %s468_s26  ;;  %v127_v47 = vld [vmem:[#allocation6 + $0x7] sm:$0x1]  ;;  %p348_p11 = scmp.ne.s32.totalorder %s252_s11, %s347_s1  ;;  %p352_p12 = scmp.lt.s32.totalorder %s252_s11, %s252_s11 }
  0x33   :  { %v138_v61 = vadd.f32 %v137_v50, %v134_v48  ;;  %v141_v62 = vmul.f32 %v140_v53, %v126_v25  ;;  %v152_v63 = vadd.f32 %v151_v52, %v148_v51  ;;  %v155_v0 = vmul.f32 %v154_v54, %v126_v25  ;;  %s39_s7 = smul.f32 %s489_s30, %s489_s30  ;;  %v128_v48 = vld [vmem:[#allocation6 + $0x9] sm:$0x1]  ;;  %p353_p13 = scmp.lt.s32.totalorder %s351_s12, %s347_s1 }
  0x34   :  { %305 = vrcp.f32 %v173_v55  ;;  %v96_v3 = vmul.f32 %v95_v56, %v61_v57  ;;  %v103_v4 = vmul.f32 %v102_v59, %v75_v58  ;;  %v144_v8 = vstv %s479_s27 }
  0x35   :  { %v142_v5 = vadd.f32 %v141_v62, %v138_v61  ;;  %v156_v6 = vadd.f32 %v155_v0, %v152_v63  ;;  %v158_v9 = vstv %s482_s28  ;;  %v99_v11 = vstv %s485_s0  ;;  %p354_p0 = por %p353_p13, %p352_p12 }
  0x36   :  { %v106_v12 = vstv %s487_s29  ;;  %v179_v20 = vstv %s492_s3  ;;  %v186_v21 = vstv %s494_s4  ;;  %v217_v25 = vmul.f32 %v211_v13, %v211_v13  ;;  %s208_s9 = smul.f32 %s261_s8, %s261_s8 }
  0x37   :  { %v145_v18 = vadd.f32 %v144_v8, %v142_v5  ;;  %v159_v19 = vadd.f32 %v158_v9, %v156_v6  ;;  %v112_v32 = vstv %s39_s7  ;;  %v183_v43 = vstv %s500_s5  ;;  %p355_p1 = pnand %p354_p0, %p348_p11 }
  0x38   :  { %v222_v38 = vmul.f32 %v294_v28, %v217_v25  ;;  %v190_v44 = vstv %s502_s6 }
  0x39   :  { %v302_v60 = vpop.eup %301  ;;  %v180_v34 = vmul.f32 %v179_v20, %v145_v18  ;;  %v187_v35 = vmul.f32 %v186_v21, %v159_v19 }
  0x3a   :  { %v91_v1 = vmul.f32 %v302_v60, %v89_v22 }
  0x3b   :  { %v304_v10 = vpop.eup %303 }
  0x3c   :  { %v92_v2 = vsub.f32 2.0, %v91_v1  ;;  %v223_v26 = vmul.f32 %v304_v10, %v304_v10  ;;  %v45_v1 = vld [vmem:[#allocation6 + $0xa] sm:$0x1] }
  0x3e   :  { %v93_v7 = vmul.f32 %v302_v60, %v92_v2  ;;  %v306_v22 = vpop.eup %305  ;;  %v228_v39 = vmul.f32 %v295_v29, %v223_v26  ;;  %v46_v2 = vld [vmem:[#allocation6 + $0xc] sm:$0x1] }
  0x3f   :  { %v175_v27 = vmul.f32 %v306_v22, %v173_v55  ;;  %v47_v5 = vmul.f32 %v46_v2, %v45_v1 }
  0x40   :  { %v97_v14 = vmul.f32 %v96_v3, %v93_v7  ;;  %v104_v15 = vmul.f32 %v103_v4, %v93_v7  ;;  %v229_v49 = vadd.f32 %v228_v39, %v222_v38  ;;  %v129_v3 = vld [vmem:[#allocation6 + $0xb] sm:$0x1]  ;;  %v130_v4 = vld [vmem:[#allocation6 + $0xd] sm:$0x1] }
  0x41   :  { %v176_v33 = vsub.f32 2.0, %v175_v27  ;;  %v131_v10 = vmul.f32 %v130_v4, %v129_v3  ;;  %v121_v13 = vmul.f32 %v47_v5, %v47_v5 }
  0x42   :  { %v100_v23 = vadd.f32 %v99_v11, %v97_v14  ;;  %v107_v24 = vadd.f32 %v106_v12, %v104_v15  ;;  %v231_v54 = vsel %vm230_vm0, %v229_v49, 0.0 }
  0x43   :  { %v177_v40 = vmul.f32 %v306_v22, %v176_v33  ;;  %v232_v59 = vrot.slane %v231_v54, 4  ;;  %v204_v19 = vmul.f32 %v131_v10, %v131_v10 }
  0x44   :  { %v108_v30 = vsub.f32 %v43_v16, %v100_v23  ;;  %v109_v31 = vsub.f32 %v44_v17, %v107_v24  ;;  %v209_v24 = vstv %s208_s9 }
  0x45   :  { %v181_v45 = vmul.f32 %v180_v34, %v177_v40  ;;  %v188_v46 = vmul.f32 %v187_v35, %v177_v40  ;;  %v233_v63 = vadd.f32 %v232_v59, %v231_v54 }
  0x46   :  { %v110_v36 = vmul.f32 %v108_v30, %v108_v30  ;;  %v111_v37 = vmul.f32 %v109_v31, %v109_v31 }
  0x47   :  { %v184_v50 = vadd.f32 %v183_v43, %v181_v45  ;;  %v191_v51 = vadd.f32 %v190_v44, %v188_v46  ;;  %v234_v8 = vrot.slane %v233_v63, 2 }
  0x48   :  { %v114_v41 = vadd.f32 %v112_v32, %v110_v36  ;;  %v118_v42 = vadd.f32 %v112_v32, %v111_v37  ;;  %v113_v61 = vmul.f32 %v112_v32, %v110_v36  ;;  %v117_v62 = vmul.f32 %v112_v32, %v111_v37 }
  0x49   :  { %v192_v52 = vsub.f32 %v127_v47, %v184_v50  ;;  %v193_v53 = vsub.f32 %v128_v48, %v191_v51  ;;  %v235_v15 = vadd.f32 %v234_v8, %v233_v63 }
  0x4a   :  { %307 = vrcp.f32 %v114_v41 }
  0x4b   :  { %309 = vrcp.f32 %v118_v42  ;;  %v194_v55 = vmul.f32 %v192_v52, %v192_v52  ;;  %v195_v56 = vmul.f32 %v193_v53, %v193_v53  ;;  %v236_v22 = vrot.slane %v235_v15, 1 }
  0x4d   :  { %v197_v57 = vadd.f32 %v194_v55, %v112_v32  ;;  %v201_v58 = vadd.f32 %v195_v56, %v112_v32  ;;  %v196_v9 = vmul.f32 %v194_v55, %v112_v32  ;;  %v200_v11 = vmul.f32 %v195_v56, %v112_v32 }
  0x4e   :  { %v237_v26 = vadd.f32 %v236_v22, %v235_v15 }
  0x4f   :  { %311 = vrcp.f32 %v197_v57 }
  0x50   :  { %313 = vrcp.f32 %v201_v58 }
  0x54   :  { %v308_v60 = vpop.eup %307 }
  0x55   :  { %v310_v0 = vpop.eup %309  ;;  %v116_v6 = vmul.f32 %v308_v60, %v113_v61 }
  0x56   :  { %v120_v7 = vmul.f32 %v310_v0, %v117_v62 }
  0x58   :  { %v122_v14 = vadd.f32 %v120_v7, %v116_v6 }
  0x59   :  { %v312_v12 = vpop.eup %311 }
  0x5a   :  { %v314_v16 = vpop.eup %313  ;;  %v199_v17 = vmul.f32 %v312_v12, %v196_v9  ;;  %v123_v20 = vmul.f32 %v122_v14, %v121_v13 }
  0x5b   :  { %v203_v18 = vmul.f32 %v314_v16, %v200_v11 }
  0x5d   :  { %v205_v21 = vadd.f32 %v203_v18, %v199_v17 }
  0x5f   :  { %v206_v23 = vmul.f32 %v205_v21, %v204_v19 }
  0x61   :  { %v207_v25 = vadd.f32 %v206_v23, %v123_v20 }
  0x63   :  { %v210_v27 = vmul.f32 %v209_v24, %v207_v25 }
  0x65   :  { %v238_v28 = vadd.f32 %v237_v26, %v210_v27 }
  0x67   :  { %v240_v29 = vsel %vm239_vm1, %v238_v28, 0.0 }
  0x68   :  { %241 = vadd.xlane.f32.xlu0 %v240_v29 }
  0xf5   :  { %v242_v30 = vpop.xlane.xlu0 %241 }
  0xf6   :  { %244 = vst.msk [vmem:[#allocation7] sm:$0x1] %vm243_vm2, %v242_v30 }
  0xf7   :  { %358 = shalt.err (!%p355_p1)
}
  0xf8   :  { %s359_s15 = scalar_lea.hbm %s524_s2, 16 }
  0xf9   :  { %p360_p2 = scmp.ne.s32.totalorder %s524_s2, %s359_s15  ;;  %p363_p3 = scmp.lt.u32.totalorder %s359_s15, %s524_s2 }
  0xfb   :  { %p365_p4 = pnand %p363_p3, %p360_p2 }
  0xfd   :  { %368 = shalt.err (!%p365_p4)
}
  0xfe   :  { %254 = dma.vmem_to_hbm [thread:$0]  %s252_s11, 16, %s524_s2, [#allocation4]  }
  0xff   :  { %373 = dma.done.wait [#allocation4], 16  }
 0x100   :  { %374 = vsyncadd [#allocation4], 4294967280 }
 0x101   :  { %258 = vsyncpa [#allocation3], 1 }
 0x102   :  { %259 = vsyncpa [#allocation4], 1 }
 0x103   :  { %260 = vsyncpa [#allocation5], 1 }

</bundles_post_ra>
